<compile_context>
chip_gen: v7x
topology: tpu7x:2x2x1
jax: 0.10.0
libtpu: 0.0.40
codegen_flags: <defaults>
</compile_context>

<pallas_src>
import jax
import jax.numpy as jnp
from jax.experimental import pallas as pl
from jax.experimental.pallas import tpu as pltpu

H_ENC = 400          # Linear in_features  (wake_forward's h_enc_total width)
N_CLS = 10           # Linear out_features
SUBLANE = 8
TILE_B_MAX = 2048    # batch tile cap; multiple of 256


def _round_up(x, m):
    return ((x + m - 1) // m) * m


N_OUT = _round_up(N_CLS, SUBLANE)   # 16 : small padded output width (zeros in 10..15)


def _head_kernel(x_ref, w_ref, b_ref, o_ref):
    # (tile_b, 400) f32  @  (400, 16) f32  -> f32 on the MXU,
    # bias add in f32 on the VPU.
    acc = jnp.dot(x_ref[...], w_ref[...], preferred_element_type=jnp.float32)
    o_ref[...] = acc + b_ref[...]


def prepare_head_params(weight, bias):
    """One-time (outside the hot path) transpose + N-pad of the Linear params.

    weight: (10, 400) in PyTorch nn.Linear layout (out, in)
    bias:   (10,)
    Returns (w_pad, b_pad): (400, 16) f32, (1, 16) f32 — padded columns/lanes
    are exactly zero, so padded output lanes are exactly zero.
    """
    w_t = jnp.pad(weight.T.astype(jnp.float32), ((0, 0), (0, N_OUT - N_CLS)))
    b = jnp.pad(bias.astype(jnp.float32).reshape(1, -1),
                ((0, 0), (0, N_OUT - N_CLS)))
    return w_t, b


def classifier_head(h_enc_total, w_pad, b_pad):
    """y = h_enc_total @ W^T + b  (the nn.Linear(400, 10) head).

    h_enc_total: (B, 400) float32  (read directly, no pad/cast copy)
    w_pad:       (400, 16) f32     (from prepare_head_params)
    b_pad:       (1, 16)   f32
    """
    B, K = h_enc_total.shape
    assert K == H_ENC

    # --- batch tile selection -------------------------------------------
    b_sub = _round_up(B, SUBLANE)
    if b_sub <= 256:
        # Tiny batch: single grid step (launch-bound regime anyway).
        tile_b = b_sub
        b_total = b_sub
    else:
        # Moderate/large batch: >= 2 grid steps (keeps both v7x TCs streaming),
        # tiles a multiple of 256, capped to amortize per-step overhead.
        tile_b = min(TILE_B_MAX, _round_up(pl.cdiv(b_sub, 2), 256))
        b_total = _round_up(b_sub, tile_b)
    num_tiles = b_total // tile_b

    # Only materialize the batch pad when actually needed (aligned batches
    # skip a full activation copy).  Padded rows are zero -> sliced off below.
    x = h_enc_total
    if b_total != B:
        x = jnp.pad(h_enc_total, ((0, b_total - B), (0, 0)))

    in_bytes = b_total * H_ENC * 4 + H_ENC * N_OUT * 4 + N_OUT * 4
    out_bytes = b_total * N_OUT * 4

    out = pl.pallas_call(
        _head_kernel,
        out_shape=jax.ShapeDtypeStruct((b_total, N_OUT), jnp.float32),
        grid=(num_tiles,),
        in_specs=[
            # Streamed activation tiles; last dim 400 == full array dim.
            pl.BlockSpec((tile_b, H_ENC), lambda i: (i, 0)),
            # VMEM-resident weight / bias (constant index_map).
            pl.BlockSpec((H_ENC, N_OUT), lambda i: (0, 0)),
            pl.BlockSpec((1, N_OUT), lambda i: (0, 0)),
        ],
        out_specs=pl.BlockSpec((tile_b, N_OUT), lambda i: (i, 0)),
        compiler_params=pltpu.CompilerParams(
            dimension_semantics=("parallel",)),                # megacore / v7x
        cost_estimate=pl.CostEstimate(
            flops=2 * b_total * H_ENC * N_OUT,
            transcendentals=0,
            bytes_accessed=in_bytes + out_bytes),
    )(x, w_pad, b_pad)

    # Strip batch / class padding (fused by XLA inside the jit).
    return out[:B, :N_CLS]


if __name__ == "__main__":
    key = jax.random.PRNGKey(0)
    k_x, k_w, k_b = jax.random.split(key, 3)

    B = 8  # small demo batch

    # TODO(synk): h_enc_total would come from DRAWModel.wake_forward(x);
    # here it is synthesized directly as the kernel input.
    h_enc_total = jax.random.normal(k_x, (B, H_ENC), dtype=jnp.float32)

    # Deterministic nn.Linear-style init: U(-1/sqrt(in), 1/sqrt(in)),
    # in PyTorch (out, in) layout.
    bound = 1.0 / (H_ENC ** 0.5)
    weight = jax.random.uniform(k_w, (N_CLS, H_ENC), jnp.float32, -bound, bound)
    bias = jax.random.uniform(k_b, (N_CLS,), jnp.float32, -bound, bound)

    # One-time param prep (transpose / N-pad) outside the hot path.
    w_pad, b_pad = prepare_head_params(weight, bias)

    head = jax.jit(classifier_head)
    out = head(h_enc_total, w_pad, b_pad)
    out = jax.block_until_ready(out)

    # Full-f32 reference (kernel now runs the matmul in f32).
    ref = h_enc_total @ weight.T + bias[None, :]

    assert out.shape == (B, N_CLS)
    assert out.dtype == jnp.float32
    assert jnp.allclose(out, ref, atol=1e-3, rtol=1e-3), float(
        jnp.max(jnp.abs(out - ref)))

    print("KERNEL_OK")
</pallas_src>

<mosaic_0001>
module attributes {stable_mosaic.version = 11 : i64} {
  func.func @_head_kernel(%arg0: i32, %arg1: memref<8x400xf32, #tpu.memory_space<vmem>>, %arg2: memref<400x16xf32, #tpu.memory_space<vmem>>, %arg3: memref<1x16xf32, #tpu.memory_space<vmem>>, %arg4: memref<8x16xf32, #tpu.memory_space<vmem>>) attributes {dimension_semantics = [#tpu.dimension_semantics<parallel>], iteration_bounds = array<i64: 1>, scalar_prefetch = 0 : i64, scratch_operands = 0 : i64, tpu.core_type = #tpu.core_type<tc>, window_params = [{transform_indices = @transform_0, window_bounds = array<i64: 8, 400>}, {pipeline_mode = #tpu.pipeline_mode<synchronous>, transform_indices = @transform_1, window_bounds = array<i64: 400, 16>}, {pipeline_mode = #tpu.pipeline_mode<synchronous>, transform_indices = @transform_2, window_bounds = array<i64: 1, 16>}, {transform_indices = @transform_3, window_bounds = array<i64: 8, 16>}]} {
    %c0 = arith.constant 0 : index
    %c0_0 = arith.constant 0 : index
    %0 = vector.load %arg1[%c0, %c0_0] : memref<8x400xf32, #tpu.memory_space<vmem>>, vector<8x400xf32>
    %c0_1 = arith.constant 0 : index
    %c0_2 = arith.constant 0 : index
    %1 = vector.load %arg2[%c0_1, %c0_2] : memref<400x16xf32, #tpu.memory_space<vmem>>, vector<400x16xf32>
    %cst = arith.constant dense<0.000000e+00> : vector<8x16xf32>
    %2 = tpu.matmul %0, %1, %cst {dimension_numbers = #tpu.dot_dimension_numbers<[1], [0], [0], [1], [0, 0, 1, 1], [], []>} : vector<8x400xf32>, vector<400x16xf32>, vector<8x16xf32> -> vector<8x16xf32>
    %c0_3 = arith.constant 0 : index
    %c0_4 = arith.constant 0 : index
    %3 = vector.load %arg3[%c0_3, %c0_4] : memref<1x16xf32, #tpu.memory_space<vmem>>, vector<1x16xf32>
    %4 = vector.broadcast %3 : vector<1x16xf32> to vector<8x16xf32>
    %5 = arith.addf %2, %4 : vector<8x16xf32>
    %c0_5 = arith.constant 0 : index
    %c0_6 = arith.constant 0 : index
    %6 = vector.load %arg4[%c0_5, %c0_6] : memref<8x16xf32, #tpu.memory_space<vmem>>, vector<8x16xf32>
    tpu.vector_store %arg4[%c0_5, %c0_6], %5 {strides = array<i32>} : memref<8x16xf32, #tpu.memory_space<vmem>>, vector<8x16xf32>,
    return
  }
  func.func @transform_0(%arg0: i32) -> (i32, i32) {
    %c0_i32 = arith.constant 0 : i32
    %c0_i32_0 = arith.constant 0 : i32
    return %arg0, %c0_i32 : i32, i32
  }
  func.func @transform_1(%arg0: i32) -> (i32, i32) {
    %c0_i32 = arith.constant 0 : i32
    %c0_i32_0 = arith.constant 0 : i32
    %c0_i32_1 = arith.constant 0 : i32
    return %c0_i32, %c0_i32_0 : i32, i32
  }
  func.func @transform_2(%arg0: i32) -> (i32, i32) {
    %c0_i32 = arith.constant 0 : i32
    %c0_i32_0 = arith.constant 0 : i32
    %c0_i32_1 = arith.constant 0 : i32
    return %c0_i32, %c0_i32_0 : i32, i32
  }
  func.func @transform_3(%arg0: i32) -> (i32, i32) {
    %c0_i32 = arith.constant 0 : i32
    %c0_i32_0 = arith.constant 0 : i32
    return %arg0, %c0_i32 : i32, i32
  }
}

</mosaic_0001>

<bundles_post_ra>
// kernel: classifier_head.1
= control target key start
LH: loop header
LB: loop body
LE: loop exit
PB: predicated region body
PF: predicated region fallthrough
CT: control target
= control target key end

     0   :  { %v357_v4 = vmov 0.0|0.0   ;;  %vm76_vm0 = vcmask 130048   ;;  %s567_s0 = inlined_call_operand.vmem [shape: f32[8,400], index: 0, kind: input, shape index: {}]   ;;  %s568_s1 = inlined_call_operand.vmem [shape: f32[400,16], index: 1, kind: input, shape index: {}]   ;;  %s569_s2 = inlined_call_operand.vmem [shape: f32[1,16], index: 2, kind: input, shape index: {}]   ;;  %s570_s3 = inlined_call_operand.hbm [shape: f32[8,16], index: 3, kind: output, shape index: {}]  }
   0x1   :  { %v35_v0 = vld [vmem:[%s568_s1 + $0x80] sm:$0xff]  ;;  %v36_v1 = vld [vmem:[%s568_s1 + $0x88] sm:$0xff]  ;;  %304 = vmatprep.subr.bf16.mxu1 %v357_v4  ;;  %v37_v10 = vld [vmem:[%s568_s1 + $0x90] sm:$0xff] }
   0x2   :  { %v19_v2 = vld [vmem:[%s568_s1] sm:$0xff]  ;;  %v272_v3 = vpack.c.bf16 %v36_v1, %v35_v0  ;;  %v20_v5 = vld [vmem:[%s568_s1 + $0x8] sm:$0xff]  ;;  %v38_v11 = vld [vmem:[%s568_s1 + $0x98] sm:$0xff] }
   0x3   :  { %v51_v6 = vld [vmem:[%s568_s1 + $0x100] sm:$0xff]  ;;  %v52_v7 = vld [vmem:[%s568_s1 + $0x108] sm:$0xff]  ;;  %v274_v8 = vpack.c.bf16 %v20_v5, %v19_v2  ;;  %v21_v12 = vld [vmem:[%s568_s1 + $0x10] sm:$0xff]  ;;  %v276_v13 = vpack.c.bf16 %v38_v11, %v37_v10 }
   0x4   :  { %v305_v9 = vpack.c.bf16 %v52_v7, %v51_v6  ;;  %273 = vmatprep.subr.bf16.mxu0 %v272_v3  ;;  %v22_v14 = vld [vmem:[%s568_s1 + $0x18] sm:$0xff]  ;;  %v53_v15 = vld [vmem:[%s568_s1 + $0x110] sm:$0xff]  ;;  %v39_v19 = vld [vmem:[%s568_s1 + $0xa0] sm:$0xff] }
   0x5   :  { %v54_v16 = vld [vmem:[%s568_s1 + $0x118] sm:$0xff]  ;;  %275 = vmatpush3.bf16.msra.mxu0 %v274_v8  ;;  %v278_v17 = vpack.c.bf16 %v22_v14, %v21_v12  ;;  %v40_v20 = vld [vmem:[%s568_s1 + $0xa8] sm:$0xff]  ;;  %v23_v21 = vld [vmem:[%s568_s1 + $0x20] sm:$0xff] }
   0x6   :  { %306 = vmatpush1.bf16.msra.mxu1 %v305_v9  ;;  %v308_v18 = vpack.c.bf16 %v54_v16, %v53_v15  ;;  %277 = vmatprep.subr.bf16.mxu0 %v276_v13  ;;  %v280_v22 = vpack.c.bf16 %v40_v20, %v39_v19  ;;  %v24_v23 = vld [vmem:[%s568_s1 + $0x28] sm:$0xff]  ;;  %v55_v24 = vld [vmem:[%s568_s1 + $0x120] sm:$0xff]  ;;  %v41_v26 = vld [vmem:[%s568_s1 + $0xb0] sm:$0xff] }
   0x7   :  { %307 = vmatprep.subr.bf16.mxu1 %v357_v4  ;;  %v56_v25 = vld [vmem:[%s568_s1 + $0x128] sm:$0xff]  ;;  %v42_v27 = vld [vmem:[%s568_s1 + $0xb8] sm:$0xff]  ;;  %v282_v28 = vpack.c.bf16 %v24_v23, %v23_v21  ;;  %v25_v30 = vld [vmem:[%s568_s1 + $0x30] sm:$0xff] }
   0x8   :  { %v311_v29 = vpack.c.bf16 %v56_v25, %v55_v24  ;;  %v284_v31 = vpack.c.bf16 %v42_v27, %v41_v26  ;;  %v26_v32 = vld [vmem:[%s568_s1 + $0x38] sm:$0xff]  ;;  %v57_v33 = vld [vmem:[%s568_s1 + $0x130] sm:$0xff]  ;;  %v43_v35 = vld [vmem:[%s568_s1 + $0xc0] sm:$0xff] }
   0x9   :  { %279 = vmatpush3.bf16.msra.mxu0 %v278_v17  ;;  %v58_v34 = vld [vmem:[%s568_s1 + $0x138] sm:$0xff]  ;;  %v44_v36 = vld [vmem:[%s568_s1 + $0xc8] sm:$0xff]  ;;  %v286_v37 = vpack.c.bf16 %v26_v32, %v25_v30  ;;  %v27_v39 = vld [vmem:[%s568_s1 + $0x40] sm:$0xff] }
   0xa   :  { %309 = vmatpush1.bf16.msra.mxu1 %v308_v18  ;;  %281 = vmatprep.subr.bf16.mxu0 %v280_v22  ;;  %v314_v38 = vpack.c.bf16 %v58_v34, %v57_v33  ;;  %v288_v40 = vpack.c.bf16 %v44_v36, %v43_v35  ;;  %v28_v41 = vld [vmem:[%s568_s1 + $0x48] sm:$0xff]  ;;  %v59_v42 = vld [vmem:[%s568_s1 + $0x140] sm:$0xff]  ;;  %v45_v44 = vld [vmem:[%s568_s1 + $0xd0] sm:$0xff] }
   0xb   :  { %310 = vmatprep.subr.bf16.mxu1 %v357_v4  ;;  %v60_v43 = vld [vmem:[%s568_s1 + $0x148] sm:$0xff]  ;;  %v46_v45 = vld [vmem:[%s568_s1 + $0xd8] sm:$0xff]  ;;  %v290_v46 = vpack.c.bf16 %v28_v41, %v27_v39  ;;  %v29_v48 = vld [vmem:[%s568_s1 + $0x50] sm:$0xff] }
   0xc   :  { %v317_v47 = vpack.c.bf16 %v60_v43, %v59_v42  ;;  %v30_v49 = vld [vmem:[%s568_s1 + $0x58] sm:$0xff]  ;;  %v16_v50 = vld [vmem:[%s567_s0 + $0x8] sm:$0xff]  ;;  %v292_v51 = vpack.c.bf16 %v46_v45, %v45_v44  ;;  %v61_v52 = vld [vmem:[%s568_s1 + $0x150] sm:$0xff] }
   0xd   :  { %283 = vmatpush3.bf16.msra.mxu0 %v282_v28  ;;  %v62_v53 = vld [vmem:[%s568_s1 + $0x158] sm:$0xff]  ;;  %v47_v55 = vld [vmem:[%s568_s1 + $0xe0] sm:$0xff]  ;;  %v48_v56 = vld [vmem:[%s568_s1 + $0xe8] sm:$0xff]  ;;  %144 = vmatprep.mubr.f32.mxu0 %v16_v50 }
   0xe   :  { %312 = vmatpush1.bf16.msra.mxu1 %v311_v29  ;;  %285 = vmatprep.subr.bf16.mxu0 %v284_v31  ;;  %v18_v54 = vld [vmem:[%s567_s0 + $0x18] sm:$0xff] }
   0xf   :  { %313 = vmatprep.subr.bf16.mxu1 %v357_v4  ;;  %236 = vmatprep.mubr.msk.f32.mxu1 %vm76_vm0, %v18_v54 }
  0x11   :  { %287 = vmatpush3.bf16.msra.mxu0 %v286_v37 }
  0x12   :  { %315 = vmatpush1.bf16.msra.mxu1 %v314_v38  ;;  %289 = vmatprep.subr.bf16.mxu0 %v288_v40 }
  0x13   :  { %316 = vmatprep.subr.bf16.mxu1 %v357_v4 }
  0x14   :  { %8 = vsyncpa [#allocation3], 0  ;;  %v294_v57 = vpack.c.bf16 %v30_v49, %v29_v48  ;;  %v320_v58 = vpack.c.bf16 %v62_v53, %v61_v52  ;;  %v31_v59 = vld [vmem:[%s568_s1 + $0x60] sm:$0xff]  ;;  %v296_v60 = vpack.c.bf16 %v48_v56, %v47_v55  ;;  %v32_v61 = vld [vmem:[%s568_s1 + $0x68] sm:$0xff]  ;;  %s358_s13 = smov [#allocation2]  }
  0x15   :  { %291 = vmatpush3.bf16.msra.mxu0 %v290_v46  ;;  %v63_v62 = vld [vmem:[%s568_s1 + $0x160] sm:$0xff]  ;;  %v64_v63 = vld [vmem:[%s568_s1 + $0x168] sm:$0xff]  ;;  %v49_v0 = vld [vmem:[%s568_s1 + $0xf0] sm:$0xff]  ;;  %v298_v2 = vpack.c.bf16 %v32_v61, %v31_v59  ;;  %s227_s14 = sshll.u32 %s358_s13, 4  ;;  %s228_s14 = int_to_ptr.vmem [resolvable:$true] %s227_s14 }
  0x16   :  { %318 = vmatpush1.bf16.msra.mxu1 %v317_v47  ;;  %293 = vmatprep.subr.bf16.mxu0 %v292_v51  ;;  %v50_v1 = vld [vmem:[%s568_s1 + $0xf8] sm:$0xff]  ;;  %v323_v3 = vpack.c.bf16 %v64_v63, %v63_v62  ;;  %v33_v5 = vld [vmem:[%s568_s1 + $0x70] sm:$0xff]  ;;  %v67_v12 = vld [vmem:[%s568_s1 + $0x180] sm:$0xff]  ;;  %s333_s15 = scalar_lea.vmem %s228_s14, 128  ;;  %p338_p1 = scmp.lt.s32.totalorder %s228_s14, %s228_s14 }
  0x17   :  { %319 = vmatprep.subr.bf16.mxu1 %v357_v4  ;;  %v300_v6 = vpack.c.bf16 %v50_v1, %v49_v0  ;;  %v34_v7 = vld [vmem:[%s568_s1 + $0x78] sm:$0xff]  ;;  %v65_v8 = vld [vmem:[%s568_s1 + $0x170] sm:$0xff]  ;;  %v68_v13 = vld [vmem:[%s568_s1 + $0x188] sm:$0xff]  ;;  %p334_p0 = scmp.ne.s32.totalorder %s228_s14, %s333_s15  ;;  %p339_p2 = scmp.lt.s32.totalorder %s333_s15, %s333_s15 }
  0x18   :  { %v66_v9 = vld [vmem:[%s568_s1 + $0x178] sm:$0xff]  ;;  %v302_v10 = vpack.c.bf16 %v34_v7, %v33_v5  ;;  %v15_v14 = vld [vmem:[%s567_s0] sm:$0xff]  ;;  %v329_v15 = vpack.c.bf16 %v68_v13, %v67_v12  ;;  %v17_v16 = vld [vmem:[%s567_s0 + $0x10] sm:$0xff] }
  0x19   :  { %295 = vmatpush3.bf16.msra.mxu0 %v294_v57  ;;  %v326_v11 = vpack.c.bf16 %v66_v9, %v65_v8  ;;  %v235_v19 = vld [vmem:[%s569_s2] ss:$0 sm:$0xff]  ;;  %p340_p3 = por %p339_p2, %p338_p1 }
  0x1a   :  { %321 = vmatpush1.bf16.msra.mxu1 %v320_v58  ;;  %297 = vmatprep.subr.bf16.mxu0 %v296_v60 }
  0x1b   :  { %322 = vmatprep.subr.bf16.mxu1 %v357_v4  ;;  %p341_p4 = pnand %p340_p3, %p334_p0 }
  0x1d   :  { %299 = vmatpush3.bf16.msra.mxu0 %v298_v2 }
  0x1e   :  { %324 = vmatpush1.bf16.msra.mxu1 %v323_v3  ;;  %301 = vmatprep.subr.bf16.mxu0 %v300_v6 }
  0x1f   :  { %325 = vmatprep.subr.bf16.mxu1 %v357_v4 }
  0x21   :  { %303 = vmatpush3.bf16.msra.mxu0 %v302_v10 }
  0x22   :  { %327 = vmatpush1.bf16.msra.mxu1 %v326_v11 }
  0x23   :  { %328 = vmatprep.subr.bf16.mxu1 %v357_v4 }
  0x24   :  { %145 = vmatmul.mubr.f32.vlgmr.msra.gmra.mrb[0].mxu0 %v15_v14 }
  0x26   :  { %330 = vmatpush1.bf16.msra.mxu1 %v329_v15 }
  0x29   :  { %215 = vmatmul.mubr.f32.vlgmr.msra.gmra.mrb[0].mxu1 %v17_v16 }
  0xf7   :  { %v269_v17 = vpop.f32.mrb[0].mxu0 }
  0xf8   :  { %v270_v18 = vpop.f32.mrb[1].mxu0 }
  0xf9   :  { %v271_v20 = vadd.f32 %v270_v18, %v269_v17 }
  0xfb   :  { %v147_v21 = vadd.f32 %v271_v20, %v235_v19 }
  0xfc   :  { %v216_v22 = vpop.f32.mrb[0].mxu1 }
  0xfd   :  { %v218_v23 = vpop.f32.mrb[1].mxu1  ;;  %v217_v4 = vadd.f32 %v216_v22, %v147_v21 }
  0xff   :  { %220 = vst.msk [vmem:[#allocation2] sm:$0xff] %vm76_vm0, %v217_v4 }
 0x100   :  { %344 = shalt.err (!%p341_p4)
}
 0x101   :  { %s345_s2 = scalar_lea.hbm %s570_s3, 128 }
 0x102   :  { %p346_p5 = scmp.ne.s32.totalorder %s570_s3, %s345_s2  ;;  %p349_p6 = scmp.lt.u32.totalorder %s345_s2, %s570_s3 }
 0x104   :  { %p351_p7 = pnand %p349_p6, %p346_p5 }
 0x106   :  { %354 = shalt.err (!%p351_p7)
}
 0x107   :  { %230 = dma.vmem_to_hbm [thread:$0]  %s228_s14, 128, %s570_s3, [#allocation3]  }
 0x108   :  { %355 = dma.done.wait [#allocation3], 128  }
 0x109   :  { %356 = vsyncadd [#allocation3], 4294967168 }
 0x10a   :  { %234 = vsyncpa [#allocation3], 1 }

</bundles_post_ra>
